<compile_context>
chip_gen: v6e
topology: v6e:2x2x1
jax: 0.10.0
libtpu: 0.0.40
codegen_flags: <defaults>
</compile_context>

<pallas_src>
import jax
import jax.numpy as jnp
from jax import lax
from jax.experimental import pallas as pl
from jax.experimental.pallas import tpu as pltpu


def _flip_lanes_kernel(x_ref, o_ref):
    """Reverse the last (lane) axis of the current (TR, W) tile. Pure data movement."""
    x = x_ref[...]
    w = x.shape[-1]
    # Constant reversed lane indices; lowers to an in-vreg lane gather (XLU slot),
    # no MXU work and no dtype cast.
    rev_idx = (w - 1) - lax.broadcasted_iota(jnp.int32, x.shape, 1)
    o_ref[...] = jnp.take_along_axis(x, rev_idx, axis=-1, mode="promise_in_bounds")


def _flip_last_axis(x2):
    """x2: (R, W)  ->  (R, W) with the W axis reversed, via a row-tiled Pallas kernel."""
    R, W = x2.shape
    itemsize = jnp.dtype(x2.dtype).itemsize

    # Row-tile size: as large as possible while keeping the per-tile footprint small
    # enough that double-buffered input + output tiles (4 x tile_bytes) stay well
    # under the scoped-VMEM budget (32 MiB limit set below).
    max_tile_bytes = 4 * 1024 * 1024
    tr = max(8, min(R, (max_tile_bytes // max(1, W * itemsize)) // 8 * 8))
    if tr >= R:
        tr = R  # single block covering the full row extent (always legal)

    grid = (pl.cdiv(R, tr),)

    return pl.pallas_call(
        _flip_lanes_kernel,
        out_shape=jax.ShapeDtypeStruct((R, W), x2.dtype),
        grid_spec=pltpu.PrefetchScalarGridSpec(
            num_scalar_prefetch=0,
            grid=grid,
            in_specs=[pl.BlockSpec((tr, W), lambda i: (i, 0))],
            out_specs=pl.BlockSpec((tr, W), lambda i: (i, 0)),
        ),
        compiler_params=pltpu.CompilerParams(
            dimension_semantics=("parallel",),      # megacore / 2 TCs split the copy
            vmem_limit_bytes=32 * 1024 * 1024,      # explicit, safe on v5e/v6e/v7x
        ),
    )(x2)


def random_horizontal_flip(x, y, key, p=0.5):
    """JAX/Pallas port of MyRandomHorizontalFlip.forward.

    x: (B, C, H, W) with W odd.   y: 1-D with len >= 3.
    With probability p, x is flipped along its last axis and y[2] -> 1 - y[2].
    """
    assert x.shape[-1] % 2 == 1, "The shape of the image must be odd"
    assert y.ndim == 1 and y.shape[0] >= 3

    W = x.shape[-1]
    flip = jax.random.uniform(key, ()) < p  # Bernoulli(p), like `random.random() < p`

    def do_flip(operands):
        xo, yo = operands
        # Free wrapper-side reshape: collapse B*C*H onto the row axis so the kernel
        # only ever sees a (rows, W) lane reversal.
        x_flipped = _flip_last_axis(xo.reshape(-1, W)).reshape(xo.shape)
        # Single-scalar update; nothing to gain from a kernel here.
        y_flipped = yo.at[2].set(1.0 - yo[2])
        return x_flipped, y_flipped

    def no_flip(operands):
        return operands

    # Hoisted decision: the flip kernel (and its HBM read+write) is only paid with
    # probability p; the no-flip path does no data-movement work.
    return lax.cond(flip, do_flip, no_flip, (x, y))


if __name__ == "__main__":
    key = jax.random.PRNGKey(0)
    k_x, k_y, k_flip = jax.random.split(key, 3)

    # Small shapes consistent with the module: B=2, C=4, H=16, W=17 (W must be odd).
    x = jax.random.uniform(k_x, (2, 4, 16, 17), dtype=jnp.float32)
    y = jax.random.uniform(k_y, (8,), dtype=jnp.float32)

    flip_fn = jax.jit(random_horizontal_flip, static_argnames=("p",))
    x_out, y_out = flip_fn(x, y, k_flip, p=0.5)
    jax.block_until_ready((x_out, y_out))

    # Plain-JAX reference using the same Bernoulli draw.
    flipped = bool(jax.random.uniform(k_flip, ()) < 0.5)
    x_ref = jnp.flip(x, axis=-1) if flipped else x
    y_ref = y.at[2].set(1.0 - y[2]) if flipped else y
    assert jnp.array_equal(x_out, x_ref), "x mismatch"
    assert jnp.allclose(y_out, y_ref, atol=1e-6), "y mismatch"

    print("KERNEL_OK")
</pallas_src>

<mosaic_0001>
module attributes {stable_mosaic.version = 11 : i64} {
  func.func @_flip_lanes_kernel(%arg0: i32, %arg1: memref<128x17xf32, #tpu.memory_space<vmem>>, %arg2: memref<128x17xf32, #tpu.memory_space<vmem>>) attributes {dimension_semantics = [#tpu.dimension_semantics<parallel>], iteration_bounds = array<i64: 1>, scalar_prefetch = 0 : i64, scratch_operands = 0 : i64, tpu.core_type = #tpu.core_type<tc>, window_params = [{transform_indices = @transform_0, window_bounds = array<i64: 128, 17>}, {transform_indices = @transform_1, window_bounds = array<i64: 128, 17>}]} {
    %c0 = arith.constant 0 : index
    %c0_0 = arith.constant 0 : index
    %0 = vector.load %arg1[%c0, %c0_0] : memref<128x17xf32, #tpu.memory_space<vmem>>, vector<128x17xf32>
    %1 = tpu.iota {dimensions = array<i32: 1>} : vector<128x17xi32>
    %c16_i32 = arith.constant 16 : i32
    %2 = vector.broadcast %c16_i32 : i32 to vector<128x17xi32>
    %3 = arith.subi %2, %1 : vector<128x17xi32>
    %4 = vector.shape_cast %3 : vector<128x17xi32> to vector<128x17x1xi32>
    %5 = vector.shape_cast %4 : vector<128x17x1xi32> to vector<128x17xi32>
    %6 = tpu.dynamic_gather %0[%5] in [1] : vector<128x17xf32>, vector<128x17xi32> -> vector<128x17xf32>
    %c0_1 = arith.constant 0 : index
    %c0_2 = arith.constant 0 : index
    %7 = vector.load %arg2[%c0_1, %c0_2] : memref<128x17xf32, #tpu.memory_space<vmem>>, vector<128x17xf32>
    tpu.vector_store %arg2[%c0_1, %c0_2], %6 {strides = array<i32>} : memref<128x17xf32, #tpu.memory_space<vmem>>, vector<128x17xf32>,
    return
  }
  func.func @transform_0(%arg0: i32) -> (i32, i32) {
    %c0_i32 = arith.constant 0 : i32
    %c0_i32_0 = arith.constant 0 : i32
    return %arg0, %c0_i32 : i32, i32
  }
  func.func @transform_1(%arg0: i32) -> (i32, i32) {
    %c0_i32 = arith.constant 0 : i32
    %c0_i32_0 = arith.constant 0 : i32
    return %arg0, %c0_i32 : i32, i32
  }
}

</mosaic_0001>

<bundles_post_ra>
// kernel: branch_1_fun.1
= control target key start
LH: loop header
LB: loop body
LE: loop exit
PB: predicated region body
PF: predicated region fallthrough
CT: control target
= control target key end

     0   :  { %v25_v0 = vlaneseq  ;;  %s216_s0 = inlined_call_operand.vmem [shape: f32[128,17], index: 0, kind: input, shape index: {}]   ;;  %s217_s1 = inlined_call_operand.hbm [shape: f32[128,17], index: 1, kind: output, shape index: {}]  }
   0x2   :  { %v26_v1 = vand.u32 127, %v25_v0 }
   0x4   :  { %v27_v2 = vsub.s32 16, %v26_v1 }
   0x5   :  { %6 = vsyncpa [#allocation3], 0  ;;  %v11_v3 = vld [vmem:[%s216_s0 + $0x10] sm:$0xff]  ;;  %v9_v4 = vld [vmem:[%s216_s0] sm:$0xff]  ;;  %vm76_vm0 = vcmask 138240  }
   0x6   :  { %113 = vset.pattern.permute.xlu1 %v27_v2  ;;  %112 = vset.pattern.permute.xlu0 %v27_v2  ;;  %v12_v5 = vld [vmem:[%s216_s0 + $0x18] sm:$0xff]  ;;  %v10_v6 = vld [vmem:[%s216_s0 + $0x8] sm:$0xff]  ;;  %v13_v8 = vld [vmem:[%s216_s0 + $0x20] sm:$0xff] }
   0x7   :  { %v14_v7 = vld [vmem:[%s216_s0 + $0x28] sm:$0xff]  ;;  %v16_v9 = vld [vmem:[%s216_s0 + $0x38] sm:$0xff]  ;;  %v15_v10 = vld [vmem:[%s216_s0 + $0x30] sm:$0xff] }
   0x8   :  { %v18_v11 = vld [vmem:[%s216_s0 + $0x48] sm:$0xff]  ;;  %v17_v12 = vld [vmem:[%s216_s0 + $0x40] sm:$0xff]  ;;  %v20_v13 = vld [vmem:[%s216_s0 + $0x58] sm:$0xff] }
   0x9   :  { %v19_v14 = vld [vmem:[%s216_s0 + $0x50] sm:$0xff]  ;;  %v22_v15 = vld [vmem:[%s216_s0 + $0x68] sm:$0xff]  ;;  %v21_v16 = vld [vmem:[%s216_s0 + $0x60] sm:$0xff] }
   0xa   :  { %35 = vperm.xlu1 %113, %v11_v3   ;;  %29 = vperm.xlu0 %112, %v9_v4   ;;  %v24_v17 = vld [vmem:[%s216_s0 + $0x78] sm:$0xff]  ;;  %v23_v18 = vld [vmem:[%s216_s0 + $0x70] sm:$0xff]  ;;  %s136_s0 = smov [#allocation2]  }
   0xb   :  { %s98_s9 = sshll.u32 %s136_s0, 4  ;;  %s99_s9 = int_to_ptr.vmem [resolvable:$true] %s98_s9 }
   0xc   :  { %s114_s10 = scalar_lea.vmem %s99_s9, 2048  ;;  %p119_p1 = scmp.lt.s32.totalorder %s99_s9, %s99_s9 }
   0xd   :  { %p115_p0 = scmp.ne.s32.totalorder %s99_s9, %s114_s10  ;;  %p120_p2 = scmp.lt.s32.totalorder %s114_s10, %s114_s10 }
   0xe   :  { %38 = vperm.xlu1 %113, %v12_v5   ;;  %32 = vperm.xlu0 %112, %v10_v6  }
   0xf   :  { %p121_p3 = por %p120_p2, %p119_p1 }
  0x11   :  { %p122_p4 = pnand %p121_p3, %p115_p0 }
  0x12   :  { %44 = vperm.xlu1 %113, %v14_v7   ;;  %41 = vperm.xlu0 %112, %v13_v8  }
  0x16   :  { %50 = vperm.xlu1 %113, %v16_v9   ;;  %47 = vperm.xlu0 %112, %v15_v10  }
  0x1a   :  { %56 = vperm.xlu1 %113, %v18_v11   ;;  %53 = vperm.xlu0 %112, %v17_v12  }
  0x1e   :  { %62 = vperm.xlu1 %113, %v20_v13   ;;  %59 = vperm.xlu0 %112, %v19_v14  }
  0x22   :  { %68 = vperm.xlu1 %113, %v22_v15   ;;  %65 = vperm.xlu0 %112, %v21_v16  }
  0x26   :  { %74 = vperm.xlu1 %113, %v24_v17   ;;  %71 = vperm.xlu0 %112, %v23_v18  }
  0x85   :  { %v36_v19 = vpop.permute.xlu1 %35  ;;  %v30_v20 = vpop.permute.xlu0 %29 }
  0x86   :  { %79 = vst.msk [vmem:[#allocation2 + $0x10] sm:$0xff] %vm76_vm0, %v36_v19  ;;  %77 = vst.msk [vmem:[#allocation2] sm:$0xff] %vm76_vm0, %v30_v20 }
  0x89   :  { %v39_v21 = vpop.permute.xlu1 %38  ;;  %v33_v22 = vpop.permute.xlu0 %32 }
  0x8a   :  { %80 = vst.msk [vmem:[#allocation2 + $0x18] sm:$0xff] %vm76_vm0, %v39_v21  ;;  %78 = vst.msk [vmem:[#allocation2 + $0x8] sm:$0xff] %vm76_vm0, %v33_v22 }
  0x8d   :  { %v45_v23 = vpop.permute.xlu1 %44  ;;  %v42_v24 = vpop.permute.xlu0 %41 }
  0x8e   :  { %82 = vst.msk [vmem:[#allocation2 + $0x28] sm:$0xff] %vm76_vm0, %v45_v23  ;;  %81 = vst.msk [vmem:[#allocation2 + $0x20] sm:$0xff] %vm76_vm0, %v42_v24 }
  0x91   :  { %v51_v25 = vpop.permute.xlu1 %50  ;;  %v48_v26 = vpop.permute.xlu0 %47 }
  0x92   :  { %84 = vst.msk [vmem:[#allocation2 + $0x38] sm:$0xff] %vm76_vm0, %v51_v25  ;;  %83 = vst.msk [vmem:[#allocation2 + $0x30] sm:$0xff] %vm76_vm0, %v48_v26 }
  0x95   :  { %v57_v27 = vpop.permute.xlu1 %56  ;;  %v54_v28 = vpop.permute.xlu0 %53 }
  0x96   :  { %86 = vst.msk [vmem:[#allocation2 + $0x48] sm:$0xff] %vm76_vm0, %v57_v27  ;;  %85 = vst.msk [vmem:[#allocation2 + $0x40] sm:$0xff] %vm76_vm0, %v54_v28 }
  0x99   :  { %v63_v29 = vpop.permute.xlu1 %62  ;;  %v60_v30 = vpop.permute.xlu0 %59 }
  0x9a   :  { %88 = vst.msk [vmem:[#allocation2 + $0x58] sm:$0xff] %vm76_vm0, %v63_v29  ;;  %87 = vst.msk [vmem:[#allocation2 + $0x50] sm:$0xff] %vm76_vm0, %v60_v30 }
  0x9d   :  { %v69_v31 = vpop.permute.xlu1 %68  ;;  %v66_v32 = vpop.permute.xlu0 %65 }
  0x9e   :  { %90 = vst.msk [vmem:[#allocation2 + $0x68] sm:$0xff] %vm76_vm0, %v69_v31  ;;  %89 = vst.msk [vmem:[#allocation2 + $0x60] sm:$0xff] %vm76_vm0, %v66_v32 }
  0xa1   :  { %v75_v33 = vpop.permute.xlu1 %74  ;;  %v72_v34 = vpop.permute.xlu0 %71 }
  0xa2   :  { %92 = vst.msk [vmem:[#allocation2 + $0x78] sm:$0xff] %vm76_vm0, %v75_v33  ;;  %91 = vst.msk [vmem:[#allocation2 + $0x70] sm:$0xff] %vm76_vm0, %v72_v34 }
  0xa3   :  { %125 = shalt.err (!%p122_p4)
}
  0xa4   :  { %s137_s11 = smov 128   ;;  %s138_s12 = smov 8  }
  0xa5   :  { %104 = dma.vmem_to_hbm [thread:$0]  %s99_s9, 2048, %s217_s1, [#allocation3], %s137_s11, %s137_s11, %s138_s12  }
  0xa6   :  { %134 = dma.done.wait [#allocation3], 2048  }
  0xa7   :  { %135 = vsyncadd [#allocation3], 4294965248 }
  0xa8   :  { %108 = vsyncpa [#allocation3], 1 }

</bundles_post_ra>
